<compile_context>
chip_gen: v6e
topology: v6e:2x2x1
jax: 0.10.0
libtpu: 0.0.40
codegen_flags: <defaults>
</compile_context>

<pallas_src>
import jax
import jax.numpy as jnp
import numpy as np
from jax.experimental import pallas as pl
from jax.experimental.pallas import tpu as pltpu

# ---------------- config (mirrors the PyTorch module's __init__) -------------
INPUT_SHAPE = 32      # config['input_shape']
WIDTH       = 32      # config['width']
DEPTH       = 3       # config['depth']  -> DEPTH-1 hidden Linear(width,width)
N_HIDDEN    = DEPTH - 1
NEG_SLOPE   = 0.01    # torch.nn.LeakyReLU default negative_slope

BATCH = 16            # whole batch handled in a single kernel invocation
LANES = 128           # lane-dense output width


def _leaky_relu(z):
    # compare+select on the VPU, kept in f32 (accumulator dtype)
    return jnp.where(z > 0, z, NEG_SLOPE * z)


def mlp_kernel(x_ref, w_in_ref, b_in_ref, w_hid_ref, b_hid_ref,
               w_out_ref, b_out_ref, o_ref):
    # Input layer: (B, Din) @ (Din, W) on the MXU, bf16 operands, f32 accumulate.
    h = jnp.dot(x_ref[...], w_in_ref[...],
                preferred_element_type=jnp.float32) + b_in_ref[...]
    h = _leaky_relu(h)

    # Hidden layers (static unroll, weights stay VMEM-resident).
    for l in range(N_HIDDEN):
        h = jnp.dot(h.astype(jnp.bfloat16), w_hid_ref[l],
                    preferred_element_type=jnp.float32) + b_hid_ref[l]
        h = _leaky_relu(h)

    # Output layer (W -> 1) on the VPU/XLU: multiply by the weight row and
    # lane-reduce; avoids a full MXU push/pop for a single output column.
    out = jnp.sum(h * w_out_ref[...], axis=-1, keepdims=True) + b_out_ref[0, 0]

    # Lane-dense store: broadcast the (B, 1) result across 128 lanes; the
    # wrapper slices column 0.
    o_ref[...] = jnp.broadcast_to(out, o_ref.shape)


def dnn_forward(x, w_in, b_in, w_hid, b_hid, w_out, b_out):
    B, Din = x.shape
    W = w_in.shape[1]
    n_hidden = w_hid.shape[0]

    # bf16 operands for the MXU; biases stay f32 (added to the f32 accumulator).
    x_bf     = x.astype(jnp.bfloat16)
    w_in_bf  = w_in.astype(jnp.bfloat16)
    w_hid_bf = w_hid.astype(jnp.bfloat16)
    # Final projection weight as an f32 row for the VPU path.
    w_out_row = jnp.reshape(w_out, (1, W)).astype(jnp.float32)

    out_padded = pl.pallas_call(
        mlp_kernel,
        out_shape=jax.ShapeDtypeStruct((B, LANES), jnp.float32),
        grid=(1,),
        in_specs=[
            pl.BlockSpec((B, Din),             lambda i: (0, 0)),
            pl.BlockSpec((Din, W),             lambda i: (0, 0)),
            pl.BlockSpec((1, W),               lambda i: (0, 0)),
            pl.BlockSpec((n_hidden, W, W),     lambda i: (0, 0, 0)),
            pl.BlockSpec((n_hidden, 1, W),     lambda i: (0, 0, 0)),
            pl.BlockSpec((1, W),               lambda i: (0, 0)),
            pl.BlockSpec((1, 1), lambda i: (0, 0),
                         memory_space=pltpu.MemorySpace.SMEM),
        ],
        out_specs=pl.BlockSpec((B, LANES), lambda i: (0, 0)),
        compiler_params=pltpu.CompilerParams(
            dimension_semantics=("arbitrary",)),
    )(x_bf, w_in_bf, b_in, w_hid_bf, b_hid, w_out_row, b_out)

    # Strip the lane padding -> (B, 1), same shape as the PyTorch module output.
    return out_padded[:, :1]


def _reference(x, w_in, b_in, w_hid, b_hid, w_out, b_out):
    h = _leaky_relu(x @ w_in + b_in)
    for l in range(w_hid.shape[0]):
        h = _leaky_relu(h @ w_hid[l] + b_hid[l])
    return h @ w_out + b_out


if __name__ == "__main__":
    key = jax.random.PRNGKey(0)
    ks = jax.random.split(key, 8)

    # Deterministic synthetic parameters (per torch.nn.Linear shapes), already
    # in (in_features, out_features) layout for the kernel.
    x     = jax.random.normal(ks[0], (BATCH, INPUT_SHAPE), jnp.float32)
    w_in  = jax.random.normal(ks[1], (INPUT_SHAPE, WIDTH), jnp.float32) * 0.1
    b_in  = jax.random.normal(ks[2], (1, WIDTH), jnp.float32) * 0.1
    w_hid = jax.random.normal(ks[3], (N_HIDDEN, WIDTH, WIDTH), jnp.float32) * 0.1
    b_hid = jax.random.normal(ks[4], (N_HIDDEN, 1, WIDTH), jnp.float32) * 0.1
    w_out = jax.random.normal(ks[5], (WIDTH, 1), jnp.float32) * 0.1
    b_out = jax.random.normal(ks[6], (1, 1), jnp.float32) * 0.1

    out = dnn_forward(x, w_in, b_in, w_hid, b_hid, w_out, b_out)
    out = jax.block_until_ready(out)

    ref = _reference(x, w_in, b_in, w_hid, b_hid, w_out, b_out)
    assert out.shape == (BATCH, 1)
    # bf16 MXU operands (f32 accumulation) -> loosened tolerance vs f32 ref.
    np.testing.assert_allclose(np.asarray(out), np.asarray(ref),
                               rtol=2e-2, atol=2e-2)
    print("KERNEL_OK")
</pallas_src>

<mosaic_0001>
module attributes {stable_mosaic.version = 11 : i64} {
  func.func @mlp_kernel(%arg0: i32, %arg1: memref<16x32xbf16, #tpu.memory_space<vmem>>, %arg2: memref<32x32xbf16, #tpu.memory_space<vmem>>, %arg3: memref<1x32xf32, #tpu.memory_space<vmem>>, %arg4: memref<2x32x32xbf16, #tpu.memory_space<vmem>>, %arg5: memref<2x1x32xf32, #tpu.memory_space<vmem>>, %arg6: memref<1x32xf32, #tpu.memory_space<vmem>>, %arg7: memref<1x1xf32, #tpu.memory_space<smem>>, %arg8: memref<16x128xf32, #tpu.memory_space<vmem>>) attributes {dimension_semantics = [#tpu.dimension_semantics<arbitrary>], iteration_bounds = array<i64: 1>, scalar_prefetch = 0 : i64, scratch_operands = 0 : i64, tpu.core_type = #tpu.core_type<tc>, window_params = [{pipeline_mode = #tpu.pipeline_mode<synchronous>, transform_indices = @transform_0, window_bounds = array<i64: 16, 32>}, {pipeline_mode = #tpu.pipeline_mode<synchronous>, transform_indices = @transform_1, window_bounds = array<i64: 32, 32>}, {pipeline_mode = #tpu.pipeline_mode<synchronous>, transform_indices = @transform_2, window_bounds = array<i64: 1, 32>}, {pipeline_mode = #tpu.pipeline_mode<synchronous>, transform_indices = @transform_3, window_bounds = array<i64: 2, 32, 32>}, {pipeline_mode = #tpu.pipeline_mode<synchronous>, transform_indices = @transform_4, window_bounds = array<i64: 2, 1, 32>}, {pipeline_mode = #tpu.pipeline_mode<synchronous>, transform_indices = @transform_5, window_bounds = array<i64: 1, 32>}, {transform_indices = @transform_6, window_bounds = array<i64: 1, 1>}, {pipeline_mode = #tpu.pipeline_mode<synchronous>, transform_indices = @transform_7, window_bounds = array<i64: 16, 128>}]} {
    %c0 = arith.constant 0 : index
    %c0_0 = arith.constant 0 : index
    %0 = vector.load %arg1[%c0, %c0_0] : memref<16x32xbf16, #tpu.memory_space<vmem>>, vector<16x32xbf16>
    %c0_1 = arith.constant 0 : index
    %c0_2 = arith.constant 0 : index
    %1 = vector.load %arg2[%c0_1, %c0_2] : memref<32x32xbf16, #tpu.memory_space<vmem>>, vector<32x32xbf16>
    %cst = arith.constant dense<0.000000e+00> : vector<16x32xf32>
    %2 = tpu.matmul %0, %1, %cst {dimension_numbers = #tpu.dot_dimension_numbers<[1], [0], [0], [1], [0, 0, 1, 1], [], []>} : vector<16x32xbf16>, vector<32x32xbf16>, vector<16x32xf32> -> vector<16x32xf32>
    %c0_3 = arith.constant 0 : index
    %c0_4 = arith.constant 0 : index
    %3 = vector.load %arg3[%c0_3, %c0_4] : memref<1x32xf32, #tpu.memory_space<vmem>>, vector<1x32xf32>
    %4 = vector.broadcast %3 : vector<1x32xf32> to vector<16x32xf32>
    %5 = arith.addf %2, %4 : vector<16x32xf32>
    %cst_5 = arith.constant 0.000000e+00 : f32
    %6 = vector.broadcast %cst_5 : f32 to vector<16x32xf32>
    %7 = arith.cmpf ogt, %5, %6 : vector<16x32xf32>
    %cst_6 = arith.constant 0.00999999977 : f32
    %8 = vector.broadcast %cst_6 : f32 to vector<16x32xf32>
    %9 = arith.mulf %8, %5 : vector<16x32xf32>
    %10 = arith.select %7, %5, %9 : vector<16x32xi1>, vector<16x32xf32>
    %11 = arith.truncf %10 : vector<16x32xf32> to vector<16x32xbf16>
    %c0_7 = arith.constant 0 : index
    %c0_8 = arith.constant 0 : index
    %c0_9 = arith.constant 0 : index
    %12 = vector.load %arg4[%c0_7, %c0_8, %c0_9] : memref<2x32x32xbf16, #tpu.memory_space<vmem>>, vector<1x32x32xbf16>
    %13 = vector.shape_cast %12 : vector<1x32x32xbf16> to vector<32x32xbf16>
    %cst_10 = arith.constant dense<0.000000e+00> : vector<16x32xf32>
    %14 = tpu.matmul %11, %13, %cst_10 {dimension_numbers = #tpu.dot_dimension_numbers<[1], [0], [0], [1], [0, 0, 1, 1], [], []>} : vector<16x32xbf16>, vector<32x32xbf16>, vector<16x32xf32> -> vector<16x32xf32>
    %c0_11 = arith.constant 0 : index
    %c0_12 = arith.constant 0 : index
    %c0_13 = arith.constant 0 : index
    %15 = vector.load %arg5[%c0_11, %c0_12, %c0_13] : memref<2x1x32xf32, #tpu.memory_space<vmem>>, vector<1x1x32xf32>
    %16 = vector.shape_cast %15 : vector<1x1x32xf32> to vector<1x32xf32>
    %17 = vector.broadcast %16 : vector<1x32xf32> to vector<16x32xf32>
    %18 = arith.addf %14, %17 : vector<16x32xf32>
    %cst_14 = arith.constant 0.000000e+00 : f32
    %19 = vector.broadcast %cst_14 : f32 to vector<16x32xf32>
    %20 = arith.cmpf ogt, %18, %19 : vector<16x32xf32>
    %cst_15 = arith.constant 0.00999999977 : f32
    %21 = vector.broadcast %cst_15 : f32 to vector<16x32xf32>
    %22 = arith.mulf %21, %18 : vector<16x32xf32>
    %23 = arith.select %20, %18, %22 : vector<16x32xi1>, vector<16x32xf32>
    %24 = arith.truncf %23 : vector<16x32xf32> to vector<16x32xbf16>
    %c1 = arith.constant 1 : index
    %c0_16 = arith.constant 0 : index
    %c0_17 = arith.constant 0 : index
    %25 = vector.load %arg4[%c1, %c0_16, %c0_17] : memref<2x32x32xbf16, #tpu.memory_space<vmem>>, vector<1x32x32xbf16>
    %26 = vector.shape_cast %25 : vector<1x32x32xbf16> to vector<32x32xbf16>
    %cst_18 = arith.constant dense<0.000000e+00> : vector<16x32xf32>
    %27 = tpu.matmul %24, %26, %cst_18 {dimension_numbers = #tpu.dot_dimension_numbers<[1], [0], [0], [1], [0, 0, 1, 1], [], []>} : vector<16x32xbf16>, vector<32x32xbf16>, vector<16x32xf32> -> vector<16x32xf32>
    %c1_19 = arith.constant 1 : index
    %c0_20 = arith.constant 0 : index
    %c0_21 = arith.constant 0 : index
    %28 = vector.load %arg5[%c1_19, %c0_20, %c0_21] : memref<2x1x32xf32, #tpu.memory_space<vmem>>, vector<1x1x32xf32>
    %29 = vector.shape_cast %28 : vector<1x1x32xf32> to vector<1x32xf32>
    %30 = vector.broadcast %29 : vector<1x32xf32> to vector<16x32xf32>
    %31 = arith.addf %27, %30 : vector<16x32xf32>
    %cst_22 = arith.constant 0.000000e+00 : f32
    %32 = vector.broadcast %cst_22 : f32 to vector<16x32xf32>
    %33 = arith.cmpf ogt, %31, %32 : vector<16x32xf32>
    %cst_23 = arith.constant 0.00999999977 : f32
    %34 = vector.broadcast %cst_23 : f32 to vector<16x32xf32>
    %35 = arith.mulf %34, %31 : vector<16x32xf32>
    %36 = arith.select %33, %31, %35 : vector<16x32xi1>, vector<16x32xf32>
    %c0_24 = arith.constant 0 : index
    %c0_25 = arith.constant 0 : index
    %37 = vector.load %arg6[%c0_24, %c0_25] : memref<1x32xf32, #tpu.memory_space<vmem>>, vector<1x32xf32>
    %38 = vector.broadcast %37 : vector<1x32xf32> to vector<16x32xf32>
    %39 = arith.mulf %36, %38 : vector<16x32xf32>
    %cst_26 = arith.constant dense<0.000000e+00> : vector<16xf32>
    %40 = vector.multi_reduction <add>, %39, %cst_26 [1] : vector<16x32xf32> to vector<16xf32>
    %41 = vector.shape_cast %40 : vector<16xf32> to vector<16x1xf32>
    %c0_27 = arith.constant 0 : index
    %c0_28 = arith.constant 0 : index
    %42 = memref.load %arg7[%c0_27, %c0_28] : memref<1x1xf32, #tpu.memory_space<smem>>
    %43 = vector.broadcast %42 : f32 to vector<16x1xf32>
    %44 = arith.addf %41, %43 : vector<16x1xf32>
    %45 = vector.shape_cast %44 : vector<16x1xf32> to vector<16x1xf32>
    %46 = vector.broadcast %45 : vector<16x1xf32> to vector<16x128xf32>
    %c0_29 = arith.constant 0 : index
    %c0_30 = arith.constant 0 : index
    %47 = vector.load %arg8[%c0_29, %c0_30] : memref<16x128xf32, #tpu.memory_space<vmem>>, vector<16x128xf32>
    tpu.vector_store %arg8[%c0_29, %c0_30], %46 {strides = array<i32>} : memref<16x128xf32, #tpu.memory_space<vmem>>, vector<16x128xf32>,
    return
  }
  func.func @transform_0(%arg0: i32) -> (i32, i32) {
    %c0_i32 = arith.constant 0 : i32
    %c0_i32_0 = arith.constant 0 : i32
    %c0_i32_1 = arith.constant 0 : i32
    return %c0_i32, %c0_i32_0 : i32, i32
  }
  func.func @transform_1(%arg0: i32) -> (i32, i32) {
    %c0_i32 = arith.constant 0 : i32
    %c0_i32_0 = arith.constant 0 : i32
    %c0_i32_1 = arith.constant 0 : i32
    return %c0_i32, %c0_i32_0 : i32, i32
  }
  func.func @transform_2(%arg0: i32) -> (i32, i32) {
    %c0_i32 = arith.constant 0 : i32
    %c0_i32_0 = arith.constant 0 : i32
    %c0_i32_1 = arith.constant 0 : i32
    return %c0_i32, %c0_i32_0 : i32, i32
  }
  func.func @transform_3(%arg0: i32) -> (i32, i32, i32) {
    %c0_i32 = arith.constant 0 : i32
    %c0_i32_0 = arith.constant 0 : i32
    %c0_i32_1 = arith.constant 0 : i32
    %c0_i32_2 = arith.constant 0 : i32
    return %c0_i32, %c0_i32_0, %c0_i32_1 : i32, i32, i32
  }
  func.func @transform_4(%arg0: i32) -> (i32, i32, i32) {
    %c0_i32 = arith.constant 0 : i32
    %c0_i32_0 = arith.constant 0 : i32
    %c0_i32_1 = arith.constant 0 : i32
    %c0_i32_2 = arith.constant 0 : i32
    return %c0_i32, %c0_i32_0, %c0_i32_1 : i32, i32, i32
  }
  func.func @transform_5(%arg0: i32) -> (i32, i32) {
    %c0_i32 = arith.constant 0 : i32
    %c0_i32_0 = arith.constant 0 : i32
    %c0_i32_1 = arith.constant 0 : i32
    return %c0_i32, %c0_i32_0 : i32, i32
  }
  func.func @transform_6(%arg0: i32) -> (i32, i32) {
    %c0_i32 = arith.constant 0 : i32
    %c0_i32_0 = arith.constant 0 : i32
    %c0_i32_1 = arith.constant 0 : i32
    return %c0_i32, %c0_i32_0 : i32, i32
  }
  func.func @transform_7(%arg0: i32) -> (i32, i32) {
    %c0_i32 = arith.constant 0 : i32
    %c0_i32_0 = arith.constant 0 : i32
    %c0_i32_1 = arith.constant 0 : i32
    return %c0_i32, %c0_i32_0 : i32, i32
  }
}

</mosaic_0001>

<bundles_post_ra>
// kernel: tpu_custom_call.1
= control target key start
LH: loop header
LB: loop body
LE: loop exit
PB: predicated region body
PF: predicated region fallthrough
CT: control target
= control target key end

     0   :  { %13 = vsyncpa [#allocation4], 0  ;;  %s573_s0 = inlined_call_operand.hbm [shape: bf16[16,32], index: 0, kind: input, shape index: {}]   ;;  %s574_s1 = inlined_call_operand.hbm [shape: bf16[32,32], index: 1, kind: input, shape index: {}]   ;;  %s575_s2 = inlined_call_operand.vmem [shape: f32[1,32], index: 2, kind: input, shape index: {}]   ;;  %s576_s3 = inlined_call_operand.hbm [shape: bf16[2,32,32], index: 3, kind: input, shape index: {}]   ;;  %s577_s4 = inlined_call_operand.vmem [shape: f32[2,1,32], index: 4, kind: input, shape index: {}]   ;;  %s578_s5 = inlined_call_operand.vmem [shape: f32[1,32], index: 5, kind: input, shape index: {}]   ;;  %s579_s6 = inlined_call_operand.<no memory space> [shape: f32[1,1], index: 6, kind: input, shape index: {}]   ;;  %s580_s7 = inlined_call_operand.hbm [shape: f32[16,128], index: 7, kind: output, shape index: {}]  }
   0x1   :  { %14 = vsyncpa [#allocation7], 0 }
   0x2   :  { %15 = vsyncpa [#allocation5], 0  ;;  %s491_s24 = smov [#allocation6]   ;;  %s492_s26 = smov [#allocation3]  }
   0x3   :  { %s33_s25 = sshll.u32 %s491_s24, 4  ;;  %s21_s27 = sshll.u32 %s492_s26, 4  ;;  %s34_s25 = int_to_ptr.vmem [resolvable:$true] %s33_s25  ;;  %s22_s27 = int_to_ptr.vmem [resolvable:$true] %s21_s27 }
   0x4   :  { %s413_s28 = scalar_lea.vmem %s34_s25, 256  ;;  %p418_p1 = scmp.lt.s32.totalorder %s34_s25, %s34_s25 }
   0x5   :  { %p414_p0 = scmp.ne.s32.totalorder %s34_s25, %s413_s28  ;;  %p419_p2 = scmp.lt.s32.totalorder %s413_s28, %s413_s28 }
   0x7   :  { %p420_p3 = por %p419_p2, %p418_p1 }
   0x9   :  { %p421_p4 = pnand %p420_p3, %p414_p0 }
   0xb   :  { %424 = shalt.err (!%p421_p4)
}
   0xc   :  { %s493_s29 = smov 64   ;;  %s494_s30 = smov 4  }
   0xd   :  { %39 = dma.hbm_to_vmem [thread:$0]  %s574_s1, 256, %s34_s25, [#allocation7], %s493_s29, %s493_s29, %s494_s30  }
   0xe   :  { %s433_s10 = scalar_lea.vmem %s22_s27, 128  ;;  %p438_p6 = scmp.lt.s32.totalorder %s22_s27, %s22_s27 }
   0xf   :  { %p434_p5 = scmp.ne.s32.totalorder %s22_s27, %s433_s10  ;;  %p439_p7 = scmp.lt.s32.totalorder %s433_s10, %s433_s10 }
  0x11   :  { %p440_p8 = por %p439_p7, %p438_p6 }
  0x13   :  { %p441_p9 = pnand %p440_p8, %p434_p5 }
  0x15   :  { %444 = shalt.err (!%p441_p9)
}
  0x16   :  { %27 = dma.hbm_to_vmem [thread:$0]  %s573_s0, 128, %s22_s27, [#allocation4], %s493_s29, %s493_s29, %s494_s30  }
  0x17   :  { %s495_s13 = smov [#allocation8]  }
  0x18   :  { %s47_s14 = sshll.u32 %s495_s13, 4  ;;  %s48_s14 = int_to_ptr.vmem [resolvable:$true] %s47_s14 }
  0x19   :  { %s453_s15 = scalar_lea.vmem %s48_s14, 512  ;;  %p458_p11 = scmp.lt.s32.totalorder %s48_s14, %s48_s14 }
  0x1a   :  { %p454_p10 = scmp.ne.s32.totalorder %s48_s14, %s453_s15  ;;  %p459_p12 = scmp.lt.s32.totalorder %s453_s15, %s453_s15 }
  0x1c   :  { %p460_p13 = por %p459_p12, %p458_p11 }
  0x1e   :  { %p461_p0 = pnand %p460_p13, %p454_p10 }
  0x20   :  { %464 = shalt.err (!%p461_p0)
}
  0x21   :  { %53 = dma.hbm_to_vmem [thread:$0]  %s576_s3, 512, %s48_s14, [#allocation7], %s493_s29, %s493_s29, %s494_s30  }
  0x22   :  { %485 = dma.done.wait [#allocation4], 128  }
  0x23   :  { %486 = vsyncadd [#allocation4], 4294967168 }
  0x24   :  { %487 = dma.done.wait [#allocation7], 768  }
  0x25   :  { %488 = vsyncadd [#allocation7], 4294966528  ;;  %v496_v0 = vmov 0.0   ;;  %vm497_vm0 = vmmov 0   ;;  %v398_v1 = vld [vmem:[#allocation6 + $0x8] sm:$0xff]   ;;  %v399_v2 = vld [vmem:[#allocation6] sm:$0xff]   ;;  %v317_v48 = vstv %s579_s6 }
  0x26   :  { %364 = vmatprep.subr.bf16.mxu0 %v496_v0  ;;  %368 = vmatprep.mubr.msk.bf16.mxu0 %vm497_vm0, %v496_v0  ;;  %v400_v3 = vld [vmem:[#allocation3] sm:$0xff]   ;;  %vm100_vm1 = vcmask 261120   ;;  %v402_v5 = vld [vmem:[#allocation8] sm:$0xff]   ;;  %v403_v18 = vld [vmem:[#allocation8 + $0x18] sm:$0xff]  }
  0x27   :  { %372 = vmatprep.subr.bf16.mxu1 %v496_v0  ;;  %376 = vmatprep.mubr.msk.bf16.mxu1 %vm497_vm0, %v496_v0  ;;  %v401_v4 = vld [vmem:[#allocation8 + $0x8] sm:$0xff]   ;;  %v404_v19 = vld [vmem:[#allocation8 + $0x10] sm:$0xff]  }
  0x28   :  { %365 = vmatpush3.bf16.msra.mxu0 %v398_v1  ;;  %373 = vmatpush3.bf16.msra.mxu1 %v401_v4  ;;  %v340_v6 = vld [vmem:[%s575_s2] ss:$0 sm:$0xff]  ;;  %v350_v32 = vld [vmem:[%s577_s4 + $0x1] ss:$0 sm:$0xff] }
  0x29   :  { %366 = vmatprep.subr.bf16.mxu0 %v496_v0  ;;  %374 = vmatprep.subr.bf16.mxu1 %v496_v0  ;;  %v345_v20 = vld [vmem:[%s577_s4] ss:$0 sm:$0xff] }
  0x2a   :  { %v354_v37 = vld [vmem:[%s578_s5] ss:$0 sm:$0xff]  ;;  %s498_s5 = smov [#allocation9]  }
  0x2b   :  { %s327_s23 = sshll.u32 %s498_s5, 4  ;;  %s328_s23 = int_to_ptr.vmem [resolvable:$true] %s327_s23 }
  0x2c   :  { %367 = vmatpush3.bf16.msra.mxu0 %v399_v2  ;;  %375 = vmatpush3.bf16.msra.mxu1 %v402_v5  ;;  %s465_s24 = scalar_lea.vmem %s328_s23, 256  ;;  %p470_p2 = scmp.lt.s32.totalorder %s328_s23, %s328_s23 }
  0x2d   :  { %380 = vmatprep.subr.bf16.mxu0 %v496_v0  ;;  %p466_p1 = scmp.ne.s32.totalorder %s328_s23, %s465_s24  ;;  %p471_p3 = scmp.lt.s32.totalorder %s465_s24, %s465_s24 }
  0x2f   :  { %369 = vmatmul.mubr.msk.bf16.vlgmr.msra.gmra.mxu0 %vm100_vm1, %v400_v3  ;;  %p472_p4 = por %p471_p3, %p470_p2 }
  0x30   :  { %384 = vmatprep.mubr.msk.bf16.mxu0 %vm497_vm0, %v496_v0  ;;  %381 = vmatpush3.bf16.msra.mxu0 %v403_v18 }
  0x31   :  { %382 = vmatprep.subr.bf16.mxu0 %v496_v0  ;;  %p473_p5 = pnand %p472_p4, %p466_p1 }
  0x34   :  { %383 = vmatpush3.bf16.msra.mxu0 %v404_v19 }
  0xef   :  { %v138_v7 = vpop.f32.mrf.mxu0 }
  0xf0   :  { %v139_v8 = vadd.f32 %v340_v6, %v138_v7 }
  0xf1   :  { %v370_v9 = vpop.f32.mrf.mxu0 }
  0xf2   :  { %v147_v11 = vmul.f32 0.01, %v139_v8  ;;  %vm145_vm2 = vcmp.gt.f32.partialorder %v139_v8, 0.0 }
  0xf3   :  { %v141_v10 = vpop.f32.mrf.mxu0 }
  0xf4   :  { %v142_v12 = vadd.f32 %v340_v6, %v141_v10  ;;  %v149_v15 = vsel %vm145_vm2, %v139_v8, %v147_v11 }
  0xf5   :  { %v371_v13 = vpop.f32.mrf.mxu0 }
  0xf6   :  { %vm146_vm3 = vcmp.gt.f32.partialorder %v142_v12, 0.0  ;;  %v148_v14 = vmul.f32 0.01, %v142_v12 }
  0xf8   :  { %v150_v16 = vsel %vm146_vm3, %v142_v12, %v148_v14 }
  0xf9   :  { %v151_v17 = vpack.c.bf16 %v150_v16, %v149_v15 }
  0xfb   :  { %377 = vmatmul.mubr.msk.bf16.vlgmr.msra.gmra.mxu1 %vm100_vm1, %v151_v17 }
 0x1bb   :  { %v212_v21 = vpop.f32.mrf.mxu1 }
 0x1bc   :  { %v213_v22 = vadd.f32 %v345_v20, %v212_v21 }
 0x1bd   :  { %v378_v23 = vpop.f32.mrf.mxu1 }
 0x1be   :  { %v221_v25 = vmul.f32 0.01, %v213_v22  ;;  %vm219_vm4 = vcmp.gt.f32.partialorder %v213_v22, 0.0 }
 0x1bf   :  { %v215_v24 = vpop.f32.mrf.mxu1 }
 0x1c0   :  { %v216_v26 = vadd.f32 %v345_v20, %v215_v24  ;;  %v223_v29 = vsel %vm219_vm4, %v213_v22, %v221_v25 }
 0x1c1   :  { %v379_v27 = vpop.f32.mrf.mxu1 }
 0x1c2   :  { %vm220_vm5 = vcmp.gt.f32.partialorder %v216_v26, 0.0  ;;  %v222_v28 = vmul.f32 0.01, %v216_v26 }
 0x1c4   :  { %v224_v30 = vsel %vm220_vm5, %v216_v26, %v222_v28 }
 0x1c5   :  { %v225_v31 = vpack.c.bf16 %v224_v30, %v223_v29 }
 0x1c7   :  { %385 = vmatmul.mubr.msk.bf16.vlgmr.msra.gmra.mxu0 %vm100_vm1, %v225_v31 }
 0x287   :  { %v288_v33 = vpop.f32.mrf.mxu0 }
 0x288   :  { %v289_v34 = vadd.f32 %v350_v32, %v288_v33 }
 0x289   :  { %v386_v35 = vpop.f32.mrf.mxu0 }
 0x28a   :  { %v297_v36 = vmul.f32 0.01, %v289_v34  ;;  %vm295_vm6 = vcmp.gt.f32.partialorder %v289_v34, 0.0 }
 0x28b   :  { %v291_v38 = vpop.f32.mrf.mxu0 }
 0x28c   :  { %v292_v39 = vadd.f32 %v350_v32, %v291_v38  ;;  %v299_v40 = vsel %vm295_vm6, %v289_v34, %v297_v36 }
 0x28d   :  { %v387_v41 = vpop.f32.mrf.mxu0  ;;  %v308_v42 = vmul.f32 %v354_v37, %v299_v40 }
 0x28e   :  { %vm296_vm7 = vcmp.gt.f32.partialorder %v292_v39, 0.0  ;;  %v298_v43 = vmul.f32 0.01, %v292_v39 }
 0x28f   :  { %v310_v44 = vsel %vm100_vm1, %v308_v42, 0.0 }
 0x290   :  { %311 = vadd.xlane.f32.xlu0 %v310_v44  ;;  %v300_v45 = vsel %vm296_vm7, %v292_v39, %v298_v43 }
 0x291   :  { %v309_v46 = vmul.f32 %v354_v37, %v300_v45 }
 0x293   :  { %v313_v47 = vsel %vm100_vm1, %v309_v46, 0.0 }
 0x294   :  { %314 = vadd.xlane.f32.xlu0 %v313_v47 }
 0x319   :  { %v312_v49 = vpop.xlane.xlu0 %311 }
 0x31a   :  { %v318_v50 = vadd.f32 %v317_v48, %v312_v49 }
 0x31c   :  { %320 = vst [vmem:[#allocation9] sm:$0xff] %v318_v50 }
 0x31d   :  { %v315_v51 = vpop.xlane.xlu0 %314 }
 0x31e   :  { %v319_v52 = vadd.f32 %v317_v48, %v315_v51 }
 0x320   :  { %321 = vst [vmem:[#allocation9 + $0x8] sm:$0xff] %v319_v52 }
 0x321   :  { %476 = shalt.err (!%p473_p5)
}
 0x322   :  { %s499_s25 = smov 128   ;;  %s500_s26 = smov 8  }
 0x323   :  { %333 = dma.vmem_to_hbm [thread:$0]  %s328_s23, 256, %s580_s7, [#allocation5], %s499_s25, %s499_s25, %s500_s26  }
 0x324   :  { %489 = dma.done.wait [#allocation5], 256  }
 0x325   :  { %490 = vsyncadd [#allocation5], 4294967040 }
 0x326   :  { %337 = vsyncpa [#allocation4], 1 }
 0x327   :  { %338 = vsyncpa [#allocation7], 1 }
 0x328   :  { %339 = vsyncpa [#allocation5], 1 }

</bundles_post_ra>
